<compile_context>
chip_gen: v5e
topology: v5e:2x2
jax: 0.10.0
libtpu: 0.0.40
codegen_flags: <defaults>
</compile_context>

<pallas_src>
import jax
import jax.numpy as jnp
from jax.experimental import pallas as pl
from jax.experimental.pallas import tpu as pltpu


# ---------------------------------------------------------------------------
# Kernel: apply the expression to one (tile_rows, lanes) tile in VMEM.
# ---------------------------------------------------------------------------
def _expression_kernel(x_ref, o_ref):
    x = x_ref[...]
    # func(x) = x * sigmoid(x): sigmoid -> EUP slot, multiply -> VPU slot.
    o_ref[...] = x * jax.nn.sigmoid(x)


# Minimum sublane count per dtype byte-width (f32 -> 8, bf16 -> 16, int8 -> 32).
_MIN_SUBLANES = {4: 8, 2: 16, 1: 32}

# Per-buffer block budget: 2 MiB/block -> <= 8 MiB live with the double-buffered
# in+out pipeline; safe on v5e (16 MiB scoped default) and v7x (64 MiB physical).
_MAX_BLOCK_BYTES = 2 * 1024 * 1024

_LANE_CHOICES = (4096, 2048, 1024, 512, 256, 128)


def _pick_lanes(n: int):
    # Widest lane-dense slab (multiple of 128) dividing n; prefer widths that
    # leave at least 8 rows so sublane tiles stay full.
    for w in _LANE_CHOICES:
        if n % w == 0 and n // w >= 8:
            return w
    for w in _LANE_CHOICES:
        if n % w == 0:
            return w
    return None


def _expression_2d(x2d: jax.Array) -> jax.Array:
    """Run the expression kernel over a lane-dense (rows, lanes) array."""
    rows, lanes = x2d.shape
    itemsize = jnp.dtype(x2d.dtype).itemsize
    sub = _MIN_SUBLANES.get(itemsize, 8)
    # Largest row tile (multiple of the dtype's sublane minimum) within budget.
    budget_rows = max(sub, (_MAX_BLOCK_BYTES // (lanes * itemsize)) // sub * sub)
    tile_rows = min(budget_rows, pl.cdiv(rows, sub) * sub)
    grid = (pl.cdiv(rows, tile_rows),)  # ragged last row-block is masked by Pallas
    return pl.pallas_call(
        _expression_kernel,
        out_shape=jax.ShapeDtypeStruct((rows, lanes), x2d.dtype),
        grid_spec=pltpu.PrefetchScalarGridSpec(
            num_scalar_prefetch=0,
            grid=grid,
            in_specs=[pl.BlockSpec((tile_rows, lanes), lambda i: (i, 0))],
            out_specs=pl.BlockSpec((tile_rows, lanes), lambda i: (i, 0)),
        ),
        compiler_params=pltpu.CompilerParams(
            dimension_semantics=("parallel",),
        ),
    )(x2d)


def _expression_xla(x: jax.Array) -> jax.Array:
    return x * jax.nn.sigmoid(x)


# ---------------------------------------------------------------------------
# Module-equivalent wrapper:  Expression(func)  ->  make_expression()
# ---------------------------------------------------------------------------
def make_expression(min_pallas_elems: int = 0):
    """Callable equivalent to Expression(lambda x: x * torch.sigmoid(x)).

    Inputs with fewer than `min_pallas_elems` elements use plain (XLA-fusible)
    jnp ops — a standalone elementwise kernel cannot beat fusion into its
    producer/consumer for tiny tensors. Default 0 always uses the Pallas path.
    """

    def forward(x: jax.Array) -> jax.Array:
        n = x.size
        if n < max(min_pallas_elems, 1):
            return _expression_xla(x)
        lanes = _pick_lanes(n)
        if lanes is None:
            # Element count not a multiple of 128: cheaper to stay in fused XLA
            # than to pay a full pad + copy HBM pass before the kernel.
            return _expression_xla(x)
        x2d = x.reshape(n // lanes, lanes)  # contiguous reshape: no HBM copy
        y2d = _expression_2d(x2d)
        return y2d.reshape(x.shape)

    return jax.jit(forward)


if __name__ == "__main__":
    key = jax.random.PRNGKey(0)
    # NCHW input consistent with a conv-style model using Expression.
    x = jax.random.normal(key, (2, 4, 16, 16), dtype=jnp.float32)

    expression = make_expression()
    y = expression(x)
    y = jax.block_until_ready(y)

    # Reference check against plain JAX (same semantics as the torch lambda).
    y_ref = x * jax.nn.sigmoid(x)
    assert y.shape == x.shape and y.dtype == x.dtype
    assert jnp.allclose(y, y_ref, atol=1e-6, rtol=1e-6)

    print("KERNEL_OK")
</pallas_src>

<mosaic_0001>
module attributes {stable_mosaic.version = 11 : i64} {
  func.func @_expression_kernel(%arg0: i32, %arg1: memref<8x256xf32, #tpu.memory_space<vmem>>, %arg2: memref<8x256xf32, #tpu.memory_space<vmem>>) attributes {dimension_semantics = [#tpu.dimension_semantics<parallel>], iteration_bounds = array<i64: 1>, scalar_prefetch = 0 : i64, scratch_operands = 0 : i64, tpu.core_type = #tpu.core_type<tc>, window_params = [{transform_indices = @transform_0, window_bounds = array<i64: 8, 256>}, {transform_indices = @transform_1, window_bounds = array<i64: 8, 256>}]} {
    %c0 = arith.constant 0 : index
    %c0_0 = arith.constant 0 : index
    %0 = vector.load %arg1[%c0, %c0_0] : memref<8x256xf32, #tpu.memory_space<vmem>>, vector<8x256xf32>
    %1 = arith.negf %0 : vector<8x256xf32>
    %2 = math.exp %1 : vector<8x256xf32>
    %cst = arith.constant 1.000000e+00 : f32
    %3 = vector.broadcast %cst : f32 to vector<8x256xf32>
    %4 = arith.addf %3, %2 : vector<8x256xf32>
    %5 = arith.divf %3, %4 : vector<8x256xf32>
    %6 = arith.mulf %0, %5 : vector<8x256xf32>
    %c0_1 = arith.constant 0 : index
    %c0_2 = arith.constant 0 : index
    %7 = vector.load %arg2[%c0_1, %c0_2] : memref<8x256xf32, #tpu.memory_space<vmem>>, vector<8x256xf32>
    tpu.vector_store %arg2[%c0_1, %c0_2], %6 {strides = array<i32>} : memref<8x256xf32, #tpu.memory_space<vmem>>, vector<8x256xf32>,
    return
  }
  func.func @transform_0(%arg0: i32) -> (i32, i32) {
    %c0_i32 = arith.constant 0 : i32
    %c0_i32_0 = arith.constant 0 : i32
    return %arg0, %c0_i32 : i32, i32
  }
  func.func @transform_1(%arg0: i32) -> (i32, i32) {
    %c0_i32 = arith.constant 0 : i32
    %c0_i32_0 = arith.constant 0 : i32
    return %arg0, %c0_i32 : i32, i32
  }
}

</mosaic_0001>

<bundles_post_ra>
// kernel: forward.1
= control target key start
LH: loop header
LB: loop body
LE: loop exit
PB: predicated region body
PF: predicated region fallthrough
CT: control target
= control target key end

     0   :  { %s88_s0 = inlined_call_operand.vmem [shape: f32[8,256], index: 0, kind: input, shape index: {}]   ;;  %s89_s1 = inlined_call_operand.vmem [shape: f32[8,256], index: 1, kind: output, shape index: {}]  }
   0x1   :  { %v8_v0 = vld [vmem:[%s88_s0] sm:$0xff]  ;;  %v9_v1 = vld [vmem:[%s88_s0 + $0x8] sm:$0xff] }
   0x2   :  { %v56_v2 = vmul.f32 -1.442695, %v8_v0  ;;  %v57_v3 = vmul.f32 -1.442695, %v9_v1 }
   0x4   :  { %58 = vpow2.f32 %v56_v2 }
   0x5   :  { %60 = vpow2.f32 %v57_v3 }
   0xa   :  { %v59_v4 = vpop.eup %58 }
   0xb   :  { %v61_v5 = vpop.eup %60  ;;  %v16_v6 = vadd.f32 1.0, %v59_v4 }
   0xc   :  { %v17_v7 = vadd.f32 1.0, %v61_v5 }
   0xd   :  { %62 = vrcp.f32 %v16_v6  ;;  %vm23_vm0 = vweird.f32 %v16_v6  ;;  %v29_v11 = vand.u32 2147483648, %v16_v6  ;;  %v27_v14 = vand.u32 2147483647, %v16_v6 }
   0xe   :  { %64 = vrcp.f32 %v17_v7  ;;  %v44_v15 = vand.u32 2147483648, %v17_v7  ;;  %vm38_vm2 = vweird.f32 %v17_v7  ;;  %v42_v17 = vand.u32 2147483647, %v17_v7 }
   0xf   :  { %v30_v19 = vor.u32 1.1754944e-38, %v29_v11  ;;  %vm28_vm5 = vcmp.eq.f32.partialorder %v27_v14, 8.507059e+37 }
  0x10   :  { %v45_v22 = vor.u32 1.1754944e-38, %v44_v15  ;;  %vm43_vm7 = vcmp.eq.f32.partialorder %v42_v17, 8.507059e+37 }
  0x13   :  { %v63_v8 = vpop.eup %62 }
  0x14   :  { %v65_v9 = vpop.eup %64  ;;  %v19_v10 = vmul.f32 %v63_v8, %v16_v6  ;;  %vm24_vm1 = vweird.f32 %v63_v8 }
  0x15   :  { %v34_v12 = vmul.f32 %v65_v9, %v17_v7  ;;  %vm39_vm3 = vweird.f32 %v65_v9  ;;  %vm25_vm4 = vmor %vm23_vm0, %vm24_vm1 }
  0x16   :  { %v20_v13 = vsub.f32 1.0, %v19_v10  ;;  %vm40_vm6 = vmor %vm38_vm2, %vm39_vm3 }
  0x17   :  { %v35_v16 = vsub.f32 1.0, %v34_v12 }
  0x18   :  { %v21_v18 = vmul.f32 %v63_v8, %v20_v13 }
  0x19   :  { %v36_v20 = vmul.f32 %v65_v9, %v35_v16 }
  0x1a   :  { %v22_v21 = vadd.f32 %v63_v8, %v21_v18 }
  0x1b   :  { %v37_v23 = vadd.f32 %v65_v9, %v36_v20 }
  0x1c   :  { %v26_v24 = vsel %vm25_vm4, %v63_v8, %v22_v21 }
  0x1d   :  { %v31_v25 = vsel %vm28_vm5, %v30_v19, %v26_v24  ;;  %v41_v26 = vsel %vm40_vm6, %v65_v9, %v37_v23 }
  0x1e   :  { %v48_v27 = vmul.f32 %v31_v25, %v8_v0  ;;  %v46_v28 = vsel %vm43_vm7, %v45_v22, %v41_v26 }
  0x1f   :  { %v49_v29 = vmul.f32 %v46_v28, %v9_v1 }
  0x20   :  { %50 = vst [vmem:[%s89_s1] sm:$0xff] %v48_v27 }
  0x21   :  { %51 = vst [vmem:[%s89_s1 + $0x8] sm:$0xff] %v49_v29 }

</bundles_post_ra>
